<compile_context>
chip_gen: v7x
topology: tpu7x:2x2x1
jax: 0.10.0
libtpu: 0.0.40
codegen_flags: <defaults>
</compile_context>

<pallas_src>
import functools
import math

import jax
import jax.numpy as jnp
from jax.experimental import pallas as pl
from jax.experimental.pallas import tpu as pltpu

# ---- module hyper-parameters (defaults from SphereProduct.__init__) ----------
M_MARGIN = 4            # self.m
BASE = 1000.0           # self.base
GAMMA = 0.12            # self.gamma
POWER = 1               # self.power
LAMBDA_MIN = 5.0        # self.LambdaMin
PI_CONST = 3.14159265   # constant used literally in the PyTorch forward
EPS = 1e-12             # F.normalize default eps


def _round_up(v: int, m: int) -> int:
    return (v + m - 1) // m * m


def _inv_one_plus_lamb(iteration):
    """1/(1+lamb) as a traced [1,1] f32 (forward() increments iter first)."""
    it = jnp.asarray(iteration, jnp.float32)
    lamb = jnp.maximum(LAMBDA_MIN, BASE * (1.0 + GAMMA * it) ** (-1.0 * POWER))
    return (1.0 / (1.0 + lamb)).reshape(1, 1).astype(jnp.float32)


def prepare_weight(weight, *, tile_c: int = 256):
    """One-time weight prep: [C, D] -> ([D, Cp] weight, [1, Cp] inverse norms).

    Do this once at init / on parameter update, NOT per step: it is a full-
    weight HBM read+write that would otherwise cost as much as the kernel's
    whole weight stream.
    """
    C, D = weight.shape
    tc = min(tile_c, _round_up(C, 128))
    Cp = _round_up(C, tc)
    w_dc = weight.T                                  # [D, C], lane-dense in C
    if Cp != C:
        w_dc = jnp.pad(w_dc, ((0, 0), (0, Cp - C)))
    w_sq = jnp.sum(w_dc * w_dc, axis=0, keepdims=True)
    inv_w = jax.lax.rsqrt(jnp.maximum(w_sq, EPS * EPS))     # [1, Cp]
    return w_dc, inv_w


def sphere_product_kernel(scale_ref, x_ref, w_ref, invw_ref, label_ref,
                          out_ref, stats_ref, *, tile_c: int):
    j = pl.program_id(1)

    # Per-row x statistics only on the first class tile; the x block is
    # revisited (DMA skipped) across the class axis, and the scratch persists.
    @pl.when(j == 0)
    def _():
        x = x_ref[...]                                        # [TB, D]
        x_sq = jnp.sum(x * x, axis=-1, keepdims=True)         # [TB, 1]
        # 1 / max(||x||, EPS) == rsqrt(max(||x||^2, EPS^2))   (EUP slot)
        stats_ref[:, 0:1] = jax.lax.rsqrt(jnp.maximum(x_sq, EPS * EPS))
        # NormOfFeature = ||x|| exactly (matches torch.norm, incl. zero rows)
        stats_ref[:, 1:2] = jnp.sqrt(x_sq)

    inv_x = stats_ref[:, 0:1]                                 # [TB, 1]
    feat_norm = stats_ref[:, 1:2]                             # [TB, 1]
    scale = scale_ref[0, 0]                                   # 1/(1+lamb), SMEM

    # cos_theta = F.linear(normalize(x), normalize(W)) via raw MXU matmul on the
    # unnormalized operands + cheap rsqrt row/column rescale afterwards.
    raw = jnp.dot(x_ref[...], w_ref[...],
                  preferred_element_type=jnp.float32)         # [TB, TC]
    cos = jnp.clip(raw * inv_x * invw_ref[...], -1.0, 1.0)

    # one_hot.scatter_(1, label, 1): compare against GLOBAL column ids.
    col_ids = j * tile_c + jax.lax.broadcasted_iota(jnp.int32, cos.shape, 1)
    is_target = col_ids == label_ref[...]                     # [TB, TC] bool

    # Gather the single target cosine per row (XLU lane reduce); the margin
    # polynomial / k / parity only ever matter at that one column per row.
    cos_t = jnp.sum(jnp.where(is_target, cos, 0.0), axis=-1, keepdims=True)

    # cos(m*theta), m = 4: Chebyshev 8c^4 - 8c^2 + 1 — on the [TB,1] vector.
    c2 = cos_t * cos_t
    cos_m = 8.0 * c2 * c2 - 8.0 * c2 + 1.0

    # k = floor(m*acos(cos)/pi) via nested threshold compares (acos monotone
    # decreasing): k = #{n : cos <= cos(n*pi/m)}.  Exact except at f32-rounded
    # threshold boundaries (measure-zero).  Parity of k = XOR of the compares.
    thr = [math.cos(n * PI_CONST / M_MARGIN) for n in range(1, M_MARGIN + 1)]
    cmp = [cos_t <= t for t in thr]
    k_i = cmp[0].astype(jnp.int32)
    parity = cmp[0]
    for c in cmp[1:]:
        k_i = k_i + c.astype(jnp.int32)
        parity = jnp.logical_xor(parity, c)
    phi = jnp.where(parity, -cos_m, cos_m) - 2.0 * k_i.astype(jnp.float32)

    # output = (cos + one_hot*(phi - cos)/(1+lamb)) * ||x||
    delta = (phi - cos_t) * scale * feat_norm                  # [TB, 1]
    out_ref[...] = (cos * feat_norm
                    + jnp.where(is_target, delta, 0.0)).astype(out_ref.dtype)


def sphere_product(x, w_dc, inv_w, label, iteration, *, out_features: int,
                   tile_b: int = 512, tile_c: int = 256):
    """Per-step forward.

    x:      [B, D] f32
    w_dc:   [D, Cp] f32   (from prepare_weight)
    inv_w:  [1, Cp] f32   (from prepare_weight)
    label:  [B] int
    iteration: python int or traced scalar (self.iter AFTER the increment)
    Returns [B, out_features] f32.
    """
    B, D = x.shape
    D2, Cp = w_dc.shape
    assert D == D2
    C = out_features

    tb = min(tile_b, _round_up(B, 8))
    tc = min(tile_c, Cp)
    assert Cp % tc == 0
    Bp = _round_up(B, tb)

    x_p = x if Bp == B else jnp.pad(x, ((0, Bp - B), (0, 0)))
    lbl = label.reshape(B, 1).astype(jnp.int32)
    # Pad labels with -1 so padded rows never take the margin path (the padded
    # output region is sliced off below anyway — do not reuse it).
    lbl_p = lbl if Bp == B else jnp.pad(lbl, ((0, Bp - B), (0, 0)),
                                        constant_values=-1)

    scale = _inv_one_plus_lamb(iteration)   # runtime scalar -> no recompile/step

    grid = (Bp // tb, Cp // tc)
    kernel = functools.partial(sphere_product_kernel, tile_c=tc)

    # VMEM: double-buffered x / w / inv_w / label tiles + out tile + scratch.
    need = 4 * (2 * (tb * D + D * tc + tc + tb) + 2 * tb * tc + 2 * tb) + (4 << 20)
    try:
        cap = int(pltpu.get_tpu_info().vmem_capacity_bytes * 0.75)
    except Exception:  # pragma: no cover - older runtimes
        cap = 96 << 20
    vmem_bytes = int(min(max(need, min(32 << 20, cap)), cap))

    out_p = pl.pallas_call(
        kernel,
        out_shape=jax.ShapeDtypeStruct((Bp, Cp), jnp.float32),
        grid=grid,
        in_specs=[
            pl.BlockSpec(memory_space=pltpu.MemorySpace.SMEM),  # 1/(1+lamb)
            pl.BlockSpec((tb, D), lambda i, j: (i, 0)),         # x tile
            pl.BlockSpec((D, tc), lambda i, j: (0, j)),         # weight [D,C] tile
            pl.BlockSpec((1, tc), lambda i, j: (0, j)),         # per-class inv norms
            pl.BlockSpec((tb, 1), lambda i, j: (i, 0)),         # labels
        ],
        out_specs=pl.BlockSpec((tb, tc), lambda i, j: (i, j)),
        scratch_shapes=[pltpu.VMEM((tb, 2), jnp.float32)],       # [1/||x||, ||x||]
        compiler_params=pltpu.CompilerParams(
            # class axis must stay "arbitrary": x-row stats are cached in
            # scratch at j == 0 and reused for the rest of that batch tile.
            dimension_semantics=("parallel", "arbitrary"),
            vmem_limit_bytes=vmem_bytes,
        ),
        cost_estimate=pl.CostEstimate(
            flops=2 * Bp * Cp * D,
            transcendentals=2 * Bp,
            # weight (and inv_w) are re-streamed once per batch tile
            bytes_accessed=4 * (Bp * D + (Bp // tb) * (D * Cp + Cp)
                                + Bp * Cp + Bp),
        ),
    )(scale, x_p, w_dc, inv_w, lbl_p)

    return out_p[:B, :C]
    # TODO(synk): for very large D (>~4-6k on v7x at tb=512/tc=256, ~2x that on
    # v5e/v6e) add a trailing "arbitrary" K grid axis with a f32 VMEM
    # accumulator (pl.when init/finalize) instead of one full-D block per tile.
    # TODO(synk): evaluate bf16 (or hi/lo bf16x2) weight streaming on v5e once
    # validated against the 1e-4 Chebyshev tolerance.


def sphere_product_full(x, weight, label, iteration=1, *,
                        tile_b: int = 512, tile_c: int = 256):
    """Convenience one-shot API matching the PyTorch module signature."""
    w_dc, inv_w = prepare_weight(weight, tile_c=tile_c)
    return sphere_product(x, w_dc, inv_w, label, iteration,
                          out_features=weight.shape[0],
                          tile_b=tile_b, tile_c=tile_c)


def _reference(x, weight, label, *, iteration: int = 1):
    # Pure-JAX reference mirroring the PyTorch forward (for sanity checking).
    lamb = max(LAMBDA_MIN, BASE * (1.0 + GAMMA * iteration) ** (-1.0 * POWER))
    feat_norm = jnp.linalg.norm(x, axis=1, keepdims=True)
    xn = x / jnp.maximum(feat_norm, EPS)
    wn = weight / jnp.maximum(
        jnp.linalg.norm(weight, axis=1, keepdims=True), EPS)
    cos = jnp.clip(xn @ wn.T, -1.0, 1.0)
    cos_m = 8.0 * cos ** 4 - 8.0 * cos ** 2 + 1.0
    theta = jnp.arccos(cos)
    k = jnp.floor(M_MARGIN * theta / PI_CONST)
    sign = jnp.where(jnp.mod(k, 2.0) == 0.0, 1.0, -1.0)       # (-1)^k
    phi = sign * cos_m - 2.0 * k
    one_hot = jax.nn.one_hot(label, cos.shape[1], dtype=cos.dtype)
    out = one_hot * (phi - cos) / (1.0 + lamb) + cos
    return out * feat_norm


if __name__ == "__main__":
    key = jax.random.PRNGKey(0)
    B, IN_FEATURES, OUT_FEATURES = 8, 32, 16

    kx, kw, kl = jax.random.split(key, 3)
    x = jax.random.normal(kx, (B, IN_FEATURES), dtype=jnp.float32)
    # xavier_uniform: U(-bound, bound), bound = sqrt(6 / (fan_in + fan_out))
    bound = math.sqrt(6.0 / (IN_FEATURES + OUT_FEATURES))
    weight = jax.random.uniform(
        kw, (OUT_FEATURES, IN_FEATURES), dtype=jnp.float32,
        minval=-bound, maxval=bound)
    label = jax.random.randint(kl, (B,), 0, OUT_FEATURES, dtype=jnp.int32)

    # Weight prepared once (persisted [D, Cp] layout + per-class inverse norms).
    w_dc, inv_w = prepare_weight(weight)

    out = sphere_product(x, w_dc, inv_w, label, iteration=1,
                         out_features=OUT_FEATURES)
    out = jax.block_until_ready(out)

    ref = _reference(x, weight, label, iteration=1)
    assert out.shape == (B, OUT_FEATURES)
    assert jnp.allclose(out, ref, atol=1e-4, rtol=1e-4), "mismatch vs reference"

    print("KERNEL_OK")
</pallas_src>

<mosaic_0001>
module attributes {stable_mosaic.version = 11 : i64} {
  func.func @sphere_product_kernel(%arg0: i32, %arg1: i32, %arg2: memref<1x1xf32, #tpu.memory_space<smem>>, %arg3: memref<8x32xf32, #tpu.memory_space<vmem>>, %arg4: memref<32x128xf32, #tpu.memory_space<vmem>>, %arg5: memref<1x128xf32, #tpu.memory_space<vmem>>, %arg6: memref<8x1xi32, #tpu.memory_space<vmem>>, %arg7: memref<8x128xf32, #tpu.memory_space<vmem>>, %arg8: memref<8x2xf32, #tpu.memory_space<vmem>>) attributes {dimension_semantics = [#tpu.dimension_semantics<parallel>, #tpu.dimension_semantics<arbitrary>], iteration_bounds = array<i64: 1, 1>, scalar_prefetch = 0 : i64, scratch_operands = 1 : i64, tpu.core_type = #tpu.core_type<tc>, window_params = [{transform_indices = @transform_0, window_bounds = array<i64: 1, 1>}, {transform_indices = @transform_1, window_bounds = array<i64: 8, 32>}, {transform_indices = @transform_2, window_bounds = array<i64: 32, 128>}, {transform_indices = @transform_3, window_bounds = array<i64: 1, 128>}, {transform_indices = @transform_4, window_bounds = array<i64: 8, 1>}, {transform_indices = @transform_5, window_bounds = array<i64: 8, 128>}]} {
    %c0_i32 = arith.constant 0 : i32
    %0 = arith.cmpi eq, %arg1, %c0_i32 : i32
    %1 = arith.extui %0 : i1 to i32
    %c0_i32_0 = arith.constant 0 : i32
    %2 = arith.cmpi ne, %1, %c0_i32_0 : i32
    scf.if %2 {
      %c0_29 = arith.constant 0 : index
      %c0_30 = arith.constant 0 : index
      %75 = vector.load %arg3[%c0_29, %c0_30] : memref<8x32xf32, #tpu.memory_space<vmem>>, vector<8x32xf32>
      %76 = arith.mulf %75, %75 : vector<8x32xf32>
      %cst_31 = arith.constant dense<0.000000e+00> : vector<8xf32>
      %77 = vector.multi_reduction <add>, %76, %cst_31 [1] : vector<8x32xf32> to vector<8xf32>
      %78 = vector.shape_cast %77 : vector<8xf32> to vector<8x1xf32>
      %cst_32 = arith.constant 1.000000e-24 : f32
      %79 = vector.broadcast %cst_32 : f32 to vector<8x1xf32>
      %80 = arith.maximumf %78, %79 : vector<8x1xf32>
      %81 = math.rsqrt %80 : vector<8x1xf32>
      %c0_33 = arith.constant 0 : index
      %c0_34 = arith.constant 0 : index
      %82 = vector.load %arg8[%c0_33, %c0_34] : memref<8x2xf32, #tpu.memory_space<vmem>>, vector<8x1xf32>
      tpu.vector_store %arg8[%c0_33, %c0_34], %81 {strides = array<i32>} : memref<8x2xf32, #tpu.memory_space<vmem>>, vector<8x1xf32>,
      %83 = math.sqrt %78 : vector<8x1xf32>
      %c0_35 = arith.constant 0 : index
      %c1_36 = arith.constant 1 : index
      %84 = vector.load %arg8[%c0_35, %c1_36] : memref<8x2xf32, #tpu.memory_space<vmem>>, vector<8x1xf32>
      tpu.vector_store %arg8[%c0_35, %c1_36], %83 {strides = array<i32>} : memref<8x2xf32, #tpu.memory_space<vmem>>, vector<8x1xf32>,
    } else {
    }
    %c0 = arith.constant 0 : index
    %c0_1 = arith.constant 0 : index
    %3 = vector.load %arg8[%c0, %c0_1] : memref<8x2xf32, #tpu.memory_space<vmem>>, vector<8x1xf32>
    %c0_2 = arith.constant 0 : index
    %c1 = arith.constant 1 : index
    %4 = vector.load %arg8[%c0_2, %c1] : memref<8x2xf32, #tpu.memory_space<vmem>>, vector<8x1xf32>
    %c0_3 = arith.constant 0 : index
    %c0_4 = arith.constant 0 : index
    %5 = memref.load %arg2[%c0_3, %c0_4] : memref<1x1xf32, #tpu.memory_space<smem>>
    %c0_5 = arith.constant 0 : index
    %c0_6 = arith.constant 0 : index
    %6 = vector.load %arg3[%c0_5, %c0_6] : memref<8x32xf32, #tpu.memory_space<vmem>>, vector<8x32xf32>
    %c0_7 = arith.constant 0 : index
    %c0_8 = arith.constant 0 : index
    %7 = vector.load %arg4[%c0_7, %c0_8] : memref<32x128xf32, #tpu.memory_space<vmem>>, vector<32x128xf32>
    %cst = arith.constant dense<0.000000e+00> : vector<8x128xf32>
    %8 = tpu.matmul %6, %7, %cst {dimension_numbers = #tpu.dot_dimension_numbers<[1], [0], [0], [1], [0, 0, 1, 1], [], []>} : vector<8x32xf32>, vector<32x128xf32>, vector<8x128xf32> -> vector<8x128xf32>
    %9 = vector.broadcast %3 : vector<8x1xf32> to vector<8x128xf32>
    %10 = arith.mulf %8, %9 : vector<8x128xf32>
    %c0_9 = arith.constant 0 : index
    %c0_10 = arith.constant 0 : index
    %11 = vector.load %arg5[%c0_9, %c0_10] : memref<1x128xf32, #tpu.memory_space<vmem>>, vector<1x128xf32>
    %12 = vector.broadcast %11 : vector<1x128xf32> to vector<8x128xf32>
    %13 = arith.mulf %10, %12 : vector<8x128xf32>
    %cst_11 = arith.constant -1.000000e+00 : f32
    %cst_12 = arith.constant 1.000000e+00 : f32
    %14 = vector.broadcast %cst_11 : f32 to vector<8x128xf32>
    %15 = arith.maximumf %14, %13 : vector<8x128xf32>
    %16 = vector.broadcast %cst_12 : f32 to vector<8x128xf32>
    %17 = arith.minimumf %16, %15 : vector<8x128xf32>
    %c128_i32 = arith.constant 128 : i32
    %18 = arith.muli %arg1, %c128_i32 : i32
    %19 = tpu.iota {dimensions = array<i32: 1>} : vector<8x128xi32>
    %20 = vector.broadcast %18 : i32 to vector<8x128xi32>
    %21 = arith.addi %20, %19 : vector<8x128xi32>
    %c0_13 = arith.constant 0 : index
    %c0_14 = arith.constant 0 : index
    %22 = vector.load %arg6[%c0_13, %c0_14] : memref<8x1xi32, #tpu.memory_space<vmem>>, vector<8x1xi32>
    %23 = vector.broadcast %22 : vector<8x1xi32> to vector<8x128xi32>
    %24 = arith.cmpi eq, %21, %23 : vector<8x128xi32>
    %cst_15 = arith.constant 0.000000e+00 : f32
    %25 = vector.broadcast %cst_15 : f32 to vector<8x128xf32>
    %26 = arith.select %24, %17, %25 : vector<8x128xi1>, vector<8x128xf32>
    %cst_16 = arith.constant dense<0.000000e+00> : vector<8xf32>
    %27 = vector.multi_reduction <add>, %26, %cst_16 [1] : vector<8x128xf32> to vector<8xf32>
    %28 = vector.shape_cast %27 : vector<8xf32> to vector<8x1xf32>
    %29 = arith.mulf %28, %28 : vector<8x1xf32>
    %cst_17 = arith.constant 8.000000e+00 : f32
    %30 = vector.broadcast %cst_17 : f32 to vector<8x1xf32>
    %31 = arith.mulf %30, %29 : vector<8x1xf32>
    %32 = arith.mulf %31, %29 : vector<8x1xf32>
    %cst_18 = arith.constant 8.000000e+00 : f32
    %33 = vector.broadcast %cst_18 : f32 to vector<8x1xf32>
    %34 = arith.mulf %33, %29 : vector<8x1xf32>
    %35 = arith.subf %32, %34 : vector<8x1xf32>
    %cst_19 = arith.constant 1.000000e+00 : f32
    %36 = vector.broadcast %cst_19 : f32 to vector<8x1xf32>
    %37 = arith.addf %35, %36 : vector<8x1xf32>
    %cst_20 = arith.constant 0.707106769 : f32
    %38 = vector.broadcast %cst_20 : f32 to vector<8x1xf32>
    %39 = arith.cmpf ole, %28, %38 : vector<8x1xf32>
    %cst_21 = arith.constant 1.79489656E-9 : f32
    %40 = vector.broadcast %cst_21 : f32 to vector<8x1xf32>
    %41 = arith.cmpf ole, %28, %40 : vector<8x1xf32>
    %cst_22 = arith.constant -0.707106769 : f32
    %42 = vector.broadcast %cst_22 : f32 to vector<8x1xf32>
    %43 = arith.cmpf ole, %28, %42 : vector<8x1xf32>
    %cst_23 = arith.constant -1.000000e+00 : f32
    %44 = vector.broadcast %cst_23 : f32 to vector<8x1xf32>
    %45 = arith.cmpf ole, %28, %44 : vector<8x1xf32>
    %46 = arith.extui %39 : vector<8x1xi1> to vector<8x1xi32>
    %47 = arith.extui %41 : vector<8x1xi1> to vector<8x1xi32>
    %48 = arith.addi %46, %47 : vector<8x1xi32>
    %49 = arith.xori %39, %41 : vector<8x1xi1>
    %50 = arith.extui %43 : vector<8x1xi1> to vector<8x1xi32>
    %51 = arith.addi %48, %50 : vector<8x1xi32>
    %52 = arith.xori %49, %43 : vector<8x1xi1>
    %53 = arith.extui %45 : vector<8x1xi1> to vector<8x1xi32>
    %54 = arith.addi %51, %53 : vector<8x1xi32>
    %55 = arith.xori %52, %45 : vector<8x1xi1>
    %cst_24 = arith.constant 0.000000e+00 : f32
    %56 = vector.broadcast %cst_24 : f32 to vector<8x1xf32>
    %57 = arith.subf %56, %37 : vector<8x1xf32>
    %58 = arith.select %55, %57, %37 : vector<8x1xi1>, vector<8x1xf32>
    %59 = arith.sitofp %54 : vector<8x1xi32> to vector<8x1xf32>
    %cst_25 = arith.constant 2.000000e+00 : f32
    %60 = vector.broadcast %cst_25 : f32 to vector<8x1xf32>
    %61 = arith.mulf %60, %59 : vector<8x1xf32>
    %62 = arith.subf %58, %61 : vector<8x1xf32>
    %63 = arith.subf %62, %28 : vector<8x1xf32>
    %64 = vector.broadcast %5 : f32 to vector<8x1xf32>
    %65 = arith.mulf %63, %64 : vector<8x1xf32>
    %66 = arith.mulf %65, %4 : vector<8x1xf32>
    %67 = vector.broadcast %4 : vector<8x1xf32> to vector<8x128xf32>
    %68 = arith.mulf %17, %67 : vector<8x128xf32>
    %cst_26 = arith.constant 0.000000e+00 : f32
    %69 = vector.shape_cast %66 : vector<8x1xf32> to vector<8x1xf32>
    %70 = vector.broadcast %69 : vector<8x1xf32> to vector<8x128xf32>
    %71 = vector.broadcast %cst_26 : f32 to vector<8x128xf32>
    %72 = arith.select %24, %70, %71 : vector<8x128xi1>, vector<8x128xf32>
    %73 = arith.addf %68, %72 : vector<8x128xf32>
    %c0_27 = arith.constant 0 : index
    %c0_28 = arith.constant 0 : index
    %74 = vector.load %arg7[%c0_27, %c0_28] : memref<8x128xf32, #tpu.memory_space<vmem>>, vector<8x128xf32>
    tpu.vector_store %arg7[%c0_27, %c0_28], %73 {strides = array<i32>} : memref<8x128xf32, #tpu.memory_space<vmem>>, vector<8x128xf32>,
    return
  }
  func.func @transform_0(%arg0: i32, %arg1: i32) -> (i32, i32) {
    %c0_i32 = arith.constant 0 : i32
    %c0_i32_0 = arith.constant 0 : i32
    %c0_i32_1 = arith.constant 0 : i32
    return %c0_i32, %c0_i32_0 : i32, i32
  }
  func.func @transform_1(%arg0: i32, %arg1: i32) -> (i32, i32) {
    %c0_i32 = arith.constant 0 : i32
    %c0_i32_0 = arith.constant 0 : i32
    return %arg0, %c0_i32 : i32, i32
  }
  func.func @transform_2(%arg0: i32, %arg1: i32) -> (i32, i32) {
    %c0_i32 = arith.constant 0 : i32
    %c0_i32_0 = arith.constant 0 : i32
    return %c0_i32, %arg1 : i32, i32
  }
  func.func @transform_3(%arg0: i32, %arg1: i32) -> (i32, i32) {
    %c0_i32 = arith.constant 0 : i32
    %c0_i32_0 = arith.constant 0 : i32
    return %c0_i32, %arg1 : i32, i32
  }
  func.func @transform_4(%arg0: i32, %arg1: i32) -> (i32, i32) {
    %c0_i32 = arith.constant 0 : i32
    %c0_i32_0 = arith.constant 0 : i32
    return %arg0, %c0_i32 : i32, i32
  }
  func.func @transform_5(%arg0: i32, %arg1: i32) -> (i32, i32) {
    %c0_i32 = arith.constant 0 : i32
    return %arg0, %arg1 : i32, i32
  }
}

</mosaic_0001>

<bundles_post_ra>
// kernel: tpu_custom_call.1
= control target key start
LH: loop header
LB: loop body
LE: loop exit
PB: predicated region body
PF: predicated region fallthrough
CT: control target
= control target key end

     0   :  { %11 = vsyncpa [#allocation5], 0  ;;  %s392_s0 = inlined_call_operand.<no memory space> [shape: f32[1,1], index: 0, kind: input, shape index: {}]   ;;  %s393_s1 = inlined_call_operand.vmem [shape: f32[8,32], index: 1, kind: input, shape index: {}]   ;;  %s394_s2 = inlined_call_operand.hbm [shape: f32[32,128], index: 2, kind: input, shape index: {}]   ;;  %s395_s3 = inlined_call_operand.vmem [shape: f32[1,128], index: 3, kind: input, shape index: {}]   ;;  %s396_s4 = inlined_call_operand.vmem [shape: s32[8,1], index: 4, kind: input, shape index: {}]   ;;  %s397_s5 = inlined_call_operand.hbm [shape: f32[8,128], index: 5, kind: output, shape index: {}]  }
   0x1   :  { %12 = vsyncpa [#allocation6], 0  ;;  %s315_s18 = smov [#allocation4]   ;;  %s267_s22 = scalar_lea.hbm %s394_s2, 512 }
   0x2   :  { %s22_s19 = sshll.u32 %s315_s18, 4  ;;  %p268_p0 = scmp.ne.s32.totalorder %s394_s2, %s267_s22  ;;  %s23_s19 = int_to_ptr.vmem [resolvable:$true] %s22_s19 }
   0x3   :  { %p271_p1 = scmp.lt.u32.totalorder %s267_s22, %s394_s2 }
   0x5   :  { %p273_p2 = pnand %p271_p1, %p268_p0 }
   0x7   :  { %276 = shalt.err (!%p273_p2)
}
   0x8   :  { %s277_s27 = scalar_lea.vmem %s23_s19, 512  ;;  %p282_p4 = scmp.lt.s32.totalorder %s23_s19, %s23_s19 }
   0x9   :  { %p278_p3 = scmp.ne.s32.totalorder %s23_s19, %s277_s27  ;;  %p283_p5 = scmp.lt.s32.totalorder %s277_s27, %s277_s27 }
   0xb   :  { %p284_p6 = por %p283_p5, %p282_p4 }
   0xd   :  { %p285_p7 = pnand %p284_p6, %p278_p3 }
   0xf   :  { %288 = shalt.err (!%p285_p7)
}
  0x10   :  { %s316_s28 = smov 128   ;;  %s317_s29 = smov 8  }
  0x11   :  { %28 = dma.hbm_to_vmem [thread:$0]  %s394_s2, 512, %s23_s19, [#allocation5], %s316_s28, %s316_s28, %s317_s29  }
  0x12   :  { %311 = dma.done.wait [#allocation5], 512  }
  0x13   :  { %312 = vsyncadd [#allocation5], 4294966784  ;;  %v318_v0 = vmov 0.0|0.0   ;;  %vm319_vm0 = vmmov 0   ;;  %v320_v1 = vmov 0.0   ;;  %v40_v2 = vld [vmem:[%s393_s1] sm:$0xff]  ;;  %v157_v25 = vlaneseq }
  0x14   :  { %244 = vmatprep.subr.bf16.mxu0 %v318_v0  ;;  %241 = vmatprep.mubr.msk.f32.mxu0 %vm319_vm0, %v320_v1  ;;  %vm42_vm1 = vcmask 261120   ;;  %v62_v3 = vld [vmem:[#allocation4] sm:$0xff]  ;;  %v63_v4 = vld [vmem:[#allocation4 + $0x8] sm:$0xff]  ;;  %v41_v5 = vmul.f32 %v40_v2, %v40_v2  ;;  %v64_v7 = vld [vmem:[#allocation4 + $0x10] sm:$0xff]  ;;  %v321_v11 = vmov 0   ;;  %vm48_vm2 = vcmask 7168  }
  0x15   :  { %v245_v6 = vpack.c.bf16 %v63_v4, %v62_v3  ;;  %v65_v8 = vld [vmem:[#allocation4 + $0x18] sm:$0xff]  ;;  %259 = vset.pattern.permute.xlu0 %v321_v11  ;;  %260 = vset.pattern.permute.xlu1 %v321_v11  ;;  %vm57_vm3 = vcmask 15368   ;;  %v322_v22 = vmov 1   ;;  %v158_v28 = vand.u32 127, %v157_v25  ;;  %s323_s11 = smov [#allocation7]  }
  0x16   :  { %v43_v9 = vsel %vm42_vm1, %v41_v5, 0.0  ;;  %v248_v10 = vpack.c.bf16 %v65_v8, %v64_v7  ;;  %v161_v12 = vld [vmem:[%s396_s4] sm:$0xff]  ;;  %v194_v52 = vstv %s392_s0  ;;  %s216_s12 = sshll.u32 %s323_s11, 4  ;;  %s217_s12 = int_to_ptr.vmem [resolvable:$true] %s216_s12 }
  0x17   :  { %246 = vmatpush3.bf16.msra.mxu0 %v245_v6  ;;  %44 = vadd.xlane.f32.xlu0 %v43_v9  ;;  %v226_v26 = vld [vmem:[%s395_s3] ss:$0 sm:$0xff]  ;;  %s289_s13 = scalar_lea.vmem %s217_s12, 128  ;;  %p294_p9 = scmp.lt.s32.totalorder %s217_s12, %s217_s12 }
  0x18   :  { %247 = vmatprep.subr.bf16.mxu0 %v318_v0  ;;  %163 = vperm.xlu1 %260, %v161_v12   ;;  %p290_p8 = scmp.ne.s32.totalorder %s217_s12, %s289_s13  ;;  %p295_p10 = scmp.lt.s32.totalorder %s289_s13, %s289_s13 }
  0x1a   :  { %p296_p11 = por %p295_p10, %p294_p9 }
  0x1b   :  { %249 = vmatpush3.bf16.msra.mxu0 %v248_v10 }
  0x1c   :  { %261 = vset.pattern.permute.xlu1 %v322_v22  ;;  %p297_p12 = pnand %p296_p11, %p290_p8 }
  0x1e   :  { %242 = vmatmul.mubr.msk.f32.vlgmr.msra.gmra.mrb[0].mxu0 %vm42_vm1, %v40_v2 }
  0x97   :  { %v164_v30 = vpop.permute.xlu1 %163 }
  0x98   :  { %vm165_vm6 = vcmp.eq.s32.totalorder %v158_v28, %v164_v30 }
  0xa4   :  { %v45_v13 = vpop.xlane.xlu0 %44 }
  0xa5   :  { %v46_v14 = vmax.f32 %v45_v13, 1e-24  ;;  %263 = vrsqrt.f32 %v45_v13  ;;  %vm52_vm4 = vcmp.eq.f32.partialorder %v45_v13, inf  ;;  %v55_v18 = vand.u32 2147483648, %v45_v13 }
  0xa6   :  { %vm54_vm5 = vcmp.eq.f32.partialorder %v45_v13, 0.0 }
  0xa7   :  { %265 = vrsqrt.f32 %v46_v14 }
  0xaf   :  { %v264_v15 = vpop.eup %263 }
  0xb0   :  { %v51_v16 = vmul.f32 %v264_v15, %v45_v13 }
  0xb1   :  { %v266_v17 = vpop.eup %265 }
  0xb2   :  { %49 = vst.msk [vmem:[#allocation2] sm:$0xff] %vm48_vm2, %v266_v17  ;;  %v53_v19 = vsel %vm52_vm4, %v45_v13, %v51_v16 }
  0xb3   :  { %v56_v20 = vsel %vm54_vm5, %v55_v18, %v53_v19 }
  0xb4   :  { %58 = vst.msk [vmem:[#allocation2] sm:$0xff] %vm57_vm3, %v56_v20 }
  0xbb   :  { %v59_v21 = vld [vmem:[#allocation2] sm:$0xff] }
  0xbc   :  { %142 = vperm.xlu0 %259, %v59_v21  }
  0xc0   :  { %262 = vset.pattern.permute.xlu0 %v322_v22 }
  0xf1   :  { %v136_v23 = vpop.f32.mrb[0].mxu0 }
  0xf2   :  { %v243_v24 = vpop.f32.mrb[1].mxu0 }
 0x13b   :  { %v143_v27 = vpop.permute.xlu0 %142 }
 0x13c   :  { %v145_v29 = vmul.f32 %v143_v27, %v136_v23 }
 0x13e   :  { %v153_v31 = vmul.f32 %v226_v26, %v145_v29 }
 0x140   :  { %v227_v32 = vclamps-f32 %v153_v31, 1.0 }
 0x142   :  { %v166_v33 = vsel %vm165_vm6, %v227_v32, 0.0 }
 0x143   :  { %167 = vadd.xlane.f32.xlu1 %v166_v33 }
 0x154   :  { %198 = vperm.xlu1 %261, %v59_v21  }
 0x1d0   :  { %v168_v34 = vpop.xlane.xlu1 %167 }
 0x1d1   :  { %v169_v35 = vmul.f32 %v168_v34, %v168_v34  ;;  %vm174_vm7 = vcmp.le.f32.partialorder %v168_v34, 0.70710677  ;;  %vm175_vm8 = vcmp.le.f32.partialorder %v168_v34, 1.7948966e-09  ;;  %vm176_vm9 = vcmp.le.f32.partialorder %v168_v34, -0.70710677 }
 0x1d2   :  { %v178_v36 = vsel %vm174_vm7, 1, %v321_v11  ;;  %v179_v37 = vsel %vm175_vm8, 1, %v321_v11  ;;  %vm177_vm10 = vcmp.le.f32.partialorder %v168_v34, -1.0  ;;  %v182_v40 = vsel %vm176_vm9, 1, %v321_v11  ;;  %vm181_vm11 = vmxor %vm174_vm7, %vm175_vm8 }
 0x1d3   :  { %v170_v38 = vmul.f32 8.0, %v169_v35  ;;  %v180_v39 = vadd.s32 %v179_v37, %v178_v36  ;;  %v185_v43 = vsel %vm177_vm10, 1, %v321_v11  ;;  %vm184_vm12 = vmxor %vm181_vm11, %vm176_vm9 }
 0x1d4   :  { %vm187_vm13 = vmxor %vm184_vm12, %vm177_vm10  ;;  %v199_v56 = vpop.permute.xlu1 %198 }
 0x1d5   :  { %v171_v41 = vmul.f32 %v170_v38, %v169_v35  ;;  %v183_v42 = vadd.s32 %v182_v40, %v180_v39  ;;  %v201_v57 = vmul.f32 %v227_v32, %v199_v56 }
 0x1d7   :  { %v172_v44 = vsub.f32 %v171_v41, %v170_v38  ;;  %v186_v45 = vadd.s32 %v185_v43, %v183_v42 }
 0x1d9   :  { %v173_v46 = vadd.f32 1.0, %v172_v44  ;;  %v190_v47 = vcvt.s32.f32 %v186_v45 }
 0x1db   :  { %v188_v48 = vsub.f32 0.0, %v173_v46  ;;  %v191_v49 = vmul.f32 2.0, %v190_v47 }
 0x1dd   :  { %v189_v50 = vsel %vm187_vm13, %v188_v48, %v173_v46 }
 0x1de   :  { %v192_v51 = vsub.f32 %v189_v50, %v191_v49 }
 0x1e0   :  { %v193_v53 = vsub.f32 %v192_v51, %v168_v34 }
 0x1e2   :  { %v195_v54 = vmul.f32 %v194_v52, %v193_v53 }
 0x1e4   :  { %v196_v55 = vmul.f32 %v195_v54, %v59_v21 }
 0x1e6   :  { %204 = vperm.xlu0 %262, %v196_v55  }
 0x265   :  { %v205_v58 = vpop.permute.xlu0 %204 }
 0x266   :  { %v207_v59 = vsel %vm165_vm6, %v205_v58, 0.0 }
 0x267   :  { %v208_v60 = vadd.f32 %v207_v59, %v201_v57 }
 0x269   :  { %209 = vst [vmem:[#allocation7] sm:$0xff] %v208_v60 }
 0x26a   :  { %300 = shalt.err (!%p297_p12)
}
 0x26b   :  { %s301_s15 = scalar_lea.hbm %s397_s5, 128 }
 0x26c   :  { %p302_p13 = scmp.ne.s32.totalorder %s397_s5, %s301_s15  ;;  %p305_p0 = scmp.lt.u32.totalorder %s301_s15, %s397_s5 }
 0x26e   :  { %p307_p1 = pnand %p305_p0, %p302_p13 }
 0x270   :  { %310 = shalt.err (!%p307_p1)
}
 0x271   :  { %219 = dma.vmem_to_hbm [thread:$0]  %s217_s12, 128, %s397_s5, [#allocation6]  }
 0x272   :  { %313 = dma.done.wait [#allocation6], 128  }
 0x273   :  { %314 = vsyncadd [#allocation6], 4294967168 }
 0x274   :  { %223 = vsyncpa [#allocation5], 1 }
 0x275   :  { %224 = vsyncpa [#allocation6], 1 }

</bundles_post_ra>
